<compile_context>
chip_gen: v7x
topology: tpu7x:2x2x1
jax: 0.10.0
libtpu: 0.0.40
codegen_flags: <defaults>
</compile_context>

<pallas_src>
import jax
import jax.numpy as jnp
from jax.experimental import pallas as pl
from jax.experimental.pallas import tpu as pltpu


def _cl_classifier_kernel(z1_ref, z2_ref, wp_ref, bp_ref, wm_ref, bm_ref, o_ref):
    w = wp_ref[...]                                    # (D, D), resident
    b = bp_ref[...]                                    # (1, D) f32

    # Two independent MXU passes over the same weight (no concat/slice copies).
    x1 = jnp.maximum(
        jnp.dot(z1_ref[...], w, preferred_element_type=jnp.float32) + b, 0.0)
    x2 = jnp.maximum(
        jnp.dot(z2_ref[...], w, preferred_element_type=jnp.float32) + b, 0.0)

    prod = x1 * x2                                     # (tile, D) f32, VPU

    # 1-unit linear mapper: VPU multiply + lane (XLU) reduction.
    logits = jnp.sum(prod * wm_ref[...], axis=-1)      # (tile,)
    y = jax.nn.sigmoid(logits + bm_ref[0])             # (tile,)

    # Lane-dense store: batch on the lane axis of the (1, tile) output block.
    o_ref[...] = y[None, :].astype(o_ref.dtype)


def _round_up(x, m):
    return (x + m - 1) // m * m


def _select_tile(B, batch_tile):
    """Pick (tile, padded_B) minimizing padding waste; prefer >= 2 grid steps."""
    Bp8 = _round_up(max(B, 8), 8)
    if Bp8 <= 128:
        return Bp8, Bp8                                # single small tile
    candidates = [t for t in (128, 256, 512) if t <= batch_tile] or [128]
    best = None
    for t in candidates:
        Bp = _round_up(B, t)
        ntiles = Bp // t
        key = (Bp - B, 0 if ntiles >= 2 else 1, -t)    # waste, 2-TC shardable, size
        if best is None or key < best[0]:
            best = (key, t, Bp)
    return best[1], best[2]


def task1_cl_classifier(z1, z2, wp_t, bp, wm, bm, *, batch_tile=512, use_bf16=False):
    """Forward pass of Task1CLClassifier.

    z1, z2 : (B, D) activations
    wp_t   : (D, D) projection weight, pre-transposed for Z @ W
    bp     : (1, D) projection bias
    wm     : (1, D) mapper weight (torch Linear(D, 1).weight layout)
    bm     : scalar-like mapper bias
    Returns: (B,) sigmoid outputs (float32).
    """
    B, D = z1.shape
    f32 = jnp.float32
    act_dtype = jnp.bfloat16 if use_bf16 else f32      # bf16 OK on v5e/v6e/v7x

    tile, Bp = _select_tile(B, batch_tile)
    num_tiles = Bp // tile

    # Only touch activations when strictly necessary (no unconditional HBM pass).
    def prep_act(a):
        if a.dtype != act_dtype:
            a = a.astype(act_dtype)
        if Bp != B:
            a = jnp.pad(a, ((0, Bp - B), (0, 0)))
        return a

    z1p = prep_act(z1)
    z2p = prep_act(z2)
    wpp = wp_t if wp_t.dtype == act_dtype else wp_t.astype(act_dtype)
    bpp = bp.astype(f32).reshape(1, D)
    wmp = wm.astype(f32).reshape(1, D)
    bm1 = jnp.asarray(bm, dtype=f32).reshape(1)        # 1-D SMEM scalar (tiny pad)

    # Explicit VMEM budget: single-buffered weight + double-buffered activations.
    act_isz = 2 if use_bf16 else 4
    vmem_est = (
        D * D * act_isz                                # Wp (single-buffered)
        + 2 * 2 * tile * D * act_isz                   # z1, z2 (double-buffered)
        + 2 * D * 4                                    # bp, wm (single-buffered)
        + 2 * tile * 4                                 # output (double-buffered)
        + 3 * tile * D * 4                             # x1/x2/prod live f32 temps
    )
    vmem_limit = max(32 << 20, min(int(1.5 * vmem_est) + (2 << 20), 64 << 20))

    const = pl.Buffered(1)                             # constant-index operands

    out = pl.pallas_call(
        _cl_classifier_kernel,
        out_shape=jax.ShapeDtypeStruct((1, Bp), jnp.float32),
        grid_spec=pltpu.PrefetchScalarGridSpec(
            num_scalar_prefetch=0,
            grid=(num_tiles,),
            in_specs=[
                pl.BlockSpec((tile, D), lambda i: (i, 0)),                       # Z1 tile
                pl.BlockSpec((tile, D), lambda i: (i, 0)),                       # Z2 tile
                pl.BlockSpec((D, D), lambda i: (0, 0), pipeline_mode=const),     # Wp
                pl.BlockSpec((1, D), lambda i: (0, 0), pipeline_mode=const),     # bp
                pl.BlockSpec((1, D), lambda i: (0, 0), pipeline_mode=const),     # Wm row
                pl.BlockSpec(memory_space=pltpu.MemorySpace.SMEM),               # bm scalar
            ],
            out_specs=pl.BlockSpec((1, tile), lambda i: (0, i)),
        ),
        compiler_params=pltpu.CompilerParams(
            dimension_semantics=("parallel",),
            vmem_limit_bytes=vmem_limit,
        ),
    )(z1p, z2p, wpp, bpp, wmp, bm1)

    return out[0, :B]


def _reference(z1, z2, wp_t, bp, wm, bm):
    x1 = jnp.maximum(z1 @ wp_t + bp, 0.0)
    x2 = jnp.maximum(z2 @ wp_t + bp, 0.0)
    return jax.nn.sigmoid((x1 * x2) @ wm.T + bm)[:, 0]


def _make_params(key, in_dim):
    k_wp, k_bp, k_wm, k_bm = jax.random.split(key, 4)
    bound = 1.0 / (in_dim ** 0.5)
    wp_t = jax.random.uniform(k_wp, (in_dim, in_dim), jnp.float32, -bound, bound)
    bp = jax.random.uniform(k_bp, (1, in_dim), jnp.float32, -bound, bound)
    wm = jax.random.uniform(k_wm, (1, in_dim), jnp.float32, -bound, bound)
    bm = jax.random.uniform(k_bm, (1, 1), jnp.float32, -bound, bound)
    return wp_t, bp, wm, bm


if __name__ == "__main__":
    key = jax.random.PRNGKey(0)

    # --- Check 1: small shape (D=32, B=8), f32, single tile, no padding at all -
    in_dim, batch = 32, 8
    kp, kz1, kz2, key = jax.random.split(key, 4)
    wp_t, bp, wm, bm = _make_params(kp, in_dim)
    z1 = jax.random.normal(kz1, (batch, in_dim), jnp.float32)
    z2 = jax.random.normal(kz2, (batch, in_dim), jnp.float32)

    out = jax.block_until_ready(task1_cl_classifier(z1, z2, wp_t, bp, wm, bm))
    ref = _reference(z1, z2, wp_t, bp, wm, bm)
    assert out.shape == (batch,), out.shape
    assert jnp.allclose(out, ref, atol=1e-5, rtol=1e-5)

    # --- Check 2: ragged batch + multi-tile grid (D=40, B=300), f32 ------------
    in_dim2, batch2 = 40, 300
    kp2, ka, kb, key = jax.random.split(key, 4)
    wp2, bp2, wm2, bm2 = _make_params(kp2, in_dim2)
    a = jax.random.normal(ka, (batch2, in_dim2), jnp.float32)
    b = jax.random.normal(kb, (batch2, in_dim2), jnp.float32)

    out2 = jax.block_until_ready(task1_cl_classifier(a, b, wp2, bp2, wm2, bm2))
    ref2 = _reference(a, b, wp2, bp2, wm2, bm2)
    assert out2.shape == (batch2,), out2.shape
    assert jnp.allclose(out2, ref2, atol=1e-5, rtol=1e-5)

    # --- Check 3: aligned batch (D=128, B=256), no wrapper pad, 2 grid steps ---
    in_dim3, batch3 = 128, 256
    kp3, kc, kd, key = jax.random.split(key, 4)
    wp3, bp3, wm3, bm3 = _make_params(kp3, in_dim3)
    c = jax.random.normal(kc, (batch3, in_dim3), jnp.float32)
    d = jax.random.normal(kd, (batch3, in_dim3), jnp.float32)

    out3 = jax.block_until_ready(task1_cl_classifier(c, d, wp3, bp3, wm3, bm3))
    ref3 = _reference(c, d, wp3, bp3, wm3, bm3)
    assert out3.shape == (batch3,), out3.shape
    assert jnp.allclose(out3, ref3, atol=1e-5, rtol=1e-5)

    # --- Check 4: bf16 matmul operands (all generations), looser tolerance -----
    out4 = jax.block_until_ready(
        task1_cl_classifier(a, b, wp2, bp2, wm2, bm2, use_bf16=True))
    assert out4.shape == (batch2,), out4.shape
    assert jnp.allclose(out4, ref2, atol=5e-2, rtol=5e-2)

    print("KERNEL_OK")
</pallas_src>

<mosaic_0001>
module attributes {stable_mosaic.version = 11 : i64} {
  func.func @_cl_classifier_kernel(%arg0: i32, %arg1: memref<8x32xf32, #tpu.memory_space<vmem>>, %arg2: memref<8x32xf32, #tpu.memory_space<vmem>>, %arg3: memref<32x32xf32, #tpu.memory_space<vmem>>, %arg4: memref<1x32xf32, #tpu.memory_space<vmem>>, %arg5: memref<1x32xf32, #tpu.memory_space<vmem>>, %arg6: memref<1xf32, #tpu.memory_space<smem>>, %arg7: memref<1x8xf32, #tpu.memory_space<vmem>>) attributes {dimension_semantics = [#tpu.dimension_semantics<parallel>], iteration_bounds = array<i64: 1>, scalar_prefetch = 0 : i64, scratch_operands = 0 : i64, tpu.core_type = #tpu.core_type<tc>, window_params = [{transform_indices = @transform_0, window_bounds = array<i64: 8, 32>}, {transform_indices = @transform_1, window_bounds = array<i64: 8, 32>}, {pipeline_mode = #tpu.pipeline_mode<synchronous>, transform_indices = @transform_2, window_bounds = array<i64: 32, 32>}, {pipeline_mode = #tpu.pipeline_mode<synchronous>, transform_indices = @transform_3, window_bounds = array<i64: 1, 32>}, {pipeline_mode = #tpu.pipeline_mode<synchronous>, transform_indices = @transform_4, window_bounds = array<i64: 1, 32>}, {transform_indices = @transform_5, window_bounds = array<i64: 1>}, {transform_indices = @transform_6, window_bounds = array<i64: 1, 8>}]} {
    %c0 = arith.constant 0 : index
    %c0_0 = arith.constant 0 : index
    %0 = vector.load %arg3[%c0, %c0_0] : memref<32x32xf32, #tpu.memory_space<vmem>>, vector<32x32xf32>
    %c0_1 = arith.constant 0 : index
    %c0_2 = arith.constant 0 : index
    %1 = vector.load %arg4[%c0_1, %c0_2] : memref<1x32xf32, #tpu.memory_space<vmem>>, vector<1x32xf32>
    %c0_3 = arith.constant 0 : index
    %c0_4 = arith.constant 0 : index
    %2 = vector.load %arg1[%c0_3, %c0_4] : memref<8x32xf32, #tpu.memory_space<vmem>>, vector<8x32xf32>
    %cst = arith.constant dense<0.000000e+00> : vector<8x32xf32>
    %3 = tpu.matmul %2, %0, %cst {dimension_numbers = #tpu.dot_dimension_numbers<[1], [0], [0], [1], [0, 0, 1, 1], [], []>} : vector<8x32xf32>, vector<32x32xf32>, vector<8x32xf32> -> vector<8x32xf32>
    %4 = vector.broadcast %1 : vector<1x32xf32> to vector<8x32xf32>
    %5 = arith.addf %3, %4 : vector<8x32xf32>
    %cst_5 = arith.constant 0.000000e+00 : f32
    %6 = vector.broadcast %cst_5 : f32 to vector<8x32xf32>
    %7 = arith.maximumf %5, %6 : vector<8x32xf32>
    %c0_6 = arith.constant 0 : index
    %c0_7 = arith.constant 0 : index
    %8 = vector.load %arg2[%c0_6, %c0_7] : memref<8x32xf32, #tpu.memory_space<vmem>>, vector<8x32xf32>
    %cst_8 = arith.constant dense<0.000000e+00> : vector<8x32xf32>
    %9 = tpu.matmul %8, %0, %cst_8 {dimension_numbers = #tpu.dot_dimension_numbers<[1], [0], [0], [1], [0, 0, 1, 1], [], []>} : vector<8x32xf32>, vector<32x32xf32>, vector<8x32xf32> -> vector<8x32xf32>
    %10 = vector.broadcast %1 : vector<1x32xf32> to vector<8x32xf32>
    %11 = arith.addf %9, %10 : vector<8x32xf32>
    %cst_9 = arith.constant 0.000000e+00 : f32
    %12 = vector.broadcast %cst_9 : f32 to vector<8x32xf32>
    %13 = arith.maximumf %11, %12 : vector<8x32xf32>
    %14 = arith.mulf %7, %13 : vector<8x32xf32>
    %c0_10 = arith.constant 0 : index
    %c0_11 = arith.constant 0 : index
    %15 = vector.load %arg5[%c0_10, %c0_11] : memref<1x32xf32, #tpu.memory_space<vmem>>, vector<1x32xf32>
    %16 = vector.broadcast %15 : vector<1x32xf32> to vector<8x32xf32>
    %17 = arith.mulf %14, %16 : vector<8x32xf32>
    %cst_12 = arith.constant dense<0.000000e+00> : vector<8xf32>
    %18 = vector.multi_reduction <add>, %17, %cst_12 [1] : vector<8x32xf32> to vector<8xf32>
    %c0_13 = arith.constant 0 : index
    %19 = memref.load %arg6[%c0_13] : memref<1xf32, #tpu.memory_space<smem>>
    %20 = vector.broadcast %19 : f32 to vector<8xf32>
    %21 = arith.addf %18, %20 : vector<8xf32>
    %22 = arith.negf %21 : vector<8xf32>
    %23 = math.exp %22 : vector<8xf32>
    %cst_14 = arith.constant 1.000000e+00 : f32
    %24 = vector.broadcast %cst_14 : f32 to vector<8xf32>
    %25 = arith.addf %24, %23 : vector<8xf32>
    %26 = arith.divf %24, %25 : vector<8xf32>
    %27 = vector.shape_cast %26 : vector<8xf32> to vector<1x8xf32>
    %c0_15 = arith.constant 0 : index
    %c0_16 = arith.constant 0 : index
    %28 = vector.load %arg7[%c0_15, %c0_16] : memref<1x8xf32, #tpu.memory_space<vmem>>, vector<1x8xf32>
    tpu.vector_store %arg7[%c0_15, %c0_16], %27 {strides = array<i32>} : memref<1x8xf32, #tpu.memory_space<vmem>>, vector<1x8xf32>,
    return
  }
  func.func @transform_0(%arg0: i32) -> (i32, i32) {
    %c0_i32 = arith.constant 0 : i32
    %c0_i32_0 = arith.constant 0 : i32
    return %arg0, %c0_i32 : i32, i32
  }
  func.func @transform_1(%arg0: i32) -> (i32, i32) {
    %c0_i32 = arith.constant 0 : i32
    %c0_i32_0 = arith.constant 0 : i32
    return %arg0, %c0_i32 : i32, i32
  }
  func.func @transform_2(%arg0: i32) -> (i32, i32) {
    %c0_i32 = arith.constant 0 : i32
    %c0_i32_0 = arith.constant 0 : i32
    %c0_i32_1 = arith.constant 0 : i32
    return %c0_i32, %c0_i32_0 : i32, i32
  }
  func.func @transform_3(%arg0: i32) -> (i32, i32) {
    %c0_i32 = arith.constant 0 : i32
    %c0_i32_0 = arith.constant 0 : i32
    %c0_i32_1 = arith.constant 0 : i32
    return %c0_i32, %c0_i32_0 : i32, i32
  }
  func.func @transform_4(%arg0: i32) -> (i32, i32) {
    %c0_i32 = arith.constant 0 : i32
    %c0_i32_0 = arith.constant 0 : i32
    %c0_i32_1 = arith.constant 0 : i32
    return %c0_i32, %c0_i32_0 : i32, i32
  }
  func.func @transform_5(%arg0: i32) -> i32 {
    %c0_i32 = arith.constant 0 : i32
    %c0_i32_0 = arith.constant 0 : i32
    return %c0_i32 : i32
  }
  func.func @transform_6(%arg0: i32) -> (i32, i32) {
    %c0_i32 = arith.constant 0 : i32
    %c0_i32_0 = arith.constant 0 : i32
    return %c0_i32, %arg0 : i32, i32
  }
}

</mosaic_0001>

<bundles_post_ra>
// kernel: tpu_custom_call.1
= control target key start
LH: loop header
LB: loop body
LE: loop exit
PB: predicated region body
PF: predicated region fallthrough
CT: control target
= control target key end

     0   :  { %12 = vsyncpa [#allocation4], 0  ;;  %s531_s0 = inlined_call_operand.hbm [shape: f32[8,32], index: 0, kind: input, shape index: {}]   ;;  %s532_s1 = inlined_call_operand.hbm [shape: f32[8,32], index: 1, kind: input, shape index: {}]   ;;  %s533_s2 = inlined_call_operand.hbm [shape: f32[32,32], index: 2, kind: input, shape index: {}]   ;;  %s534_s3 = inlined_call_operand.vmem [shape: f32[1,32], index: 3, kind: input, shape index: {}]   ;;  %s535_s4 = inlined_call_operand.vmem [shape: f32[1,32], index: 4, kind: input, shape index: {}]   ;;  %s536_s5 = inlined_call_operand.<no memory space> [shape: f32[1], index: 5, kind: input, shape index: {}]   ;;  %s537_s6 = inlined_call_operand.hbm [shape: f32[1,8], index: 6, kind: output, shape index: {}]  }
   0x1   :  { %13 = vsyncpa [#allocation7], 0 }
   0x2   :  { %14 = vsyncpa [#allocation5], 0  ;;  %s427_s21 = smov [#allocation6]   ;;  %s428_s23 = smov [#allocation3]  }
   0x3   :  { %s31_s22 = sshll.u32 %s427_s21, 4  ;;  %s21_s24 = sshll.u32 %s428_s23, 4  ;;  %s32_s22 = int_to_ptr.vmem [resolvable:$true] %s31_s22  ;;  %s22_s24 = int_to_ptr.vmem [resolvable:$true] %s21_s24 }
   0x4   :  { %s333_s27 = scalar_lea.hbm %s532_s1, 128 }
   0x5   :  { %p334_p0 = scmp.ne.s32.totalorder %s532_s1, %s333_s27  ;;  %p337_p1 = scmp.lt.u32.totalorder %s333_s27, %s532_s1 }
   0x7   :  { %p339_p2 = pnand %p337_p1, %p334_p0 }
   0x9   :  { %342 = shalt.err (!%p339_p2)
}
   0xa   :  { %s343_s8 = scalar_lea.vmem %s32_s22, 128  ;;  %p348_p4 = scmp.lt.s32.totalorder %s32_s22, %s32_s22 }
   0xb   :  { %p344_p3 = scmp.ne.s32.totalorder %s32_s22, %s343_s8  ;;  %p349_p5 = scmp.lt.s32.totalorder %s343_s8, %s343_s8 }
   0xd   :  { %p350_p6 = por %p349_p5, %p348_p4 }
   0xf   :  { %p351_p7 = pnand %p350_p6, %p344_p3 }
  0x11   :  { %354 = shalt.err (!%p351_p7)
}
  0x12   :  { %34 = dma.hbm_to_vmem [thread:$0]  %s532_s1, 128, %s32_s22, [#allocation7]  }
  0x13   :  { %s355_s13 = scalar_lea.hbm %s531_s0, 128 }
  0x14   :  { %p356_p8 = scmp.ne.s32.totalorder %s531_s0, %s355_s13  ;;  %p359_p9 = scmp.lt.u32.totalorder %s355_s13, %s531_s0 }
  0x16   :  { %p361_p10 = pnand %p359_p9, %p356_p8 }
  0x18   :  { %364 = shalt.err (!%p361_p10)
}
  0x19   :  { %s365_s18 = scalar_lea.vmem %s22_s24, 128  ;;  %p370_p12 = scmp.lt.s32.totalorder %s22_s24, %s22_s24 }
  0x1a   :  { %p366_p11 = scmp.ne.s32.totalorder %s22_s24, %s365_s18  ;;  %p371_p13 = scmp.lt.s32.totalorder %s365_s18, %s365_s18 }
  0x1c   :  { %p372_p0 = por %p371_p13, %p370_p12 }
  0x1e   :  { %p373_p1 = pnand %p372_p0, %p366_p11 }
  0x20   :  { %376 = shalt.err (!%p373_p1)
}
  0x21   :  { %24 = dma.hbm_to_vmem [thread:$0]  %s531_s0, 128, %s22_s24, [#allocation4]  }
  0x22   :  { %s429_s20 = smov [#allocation8]   ;;  %s377_s25 = scalar_lea.hbm %s533_s2, 512 }
  0x23   :  { %s40_s21 = sshll.u32 %s429_s20, 4  ;;  %p378_p2 = scmp.ne.s32.totalorder %s533_s2, %s377_s25  ;;  %s41_s21 = int_to_ptr.vmem [resolvable:$true] %s40_s21 }
  0x24   :  { %p381_p3 = scmp.lt.u32.totalorder %s377_s25, %s533_s2 }
  0x26   :  { %p383_p4 = pnand %p381_p3, %p378_p2 }
  0x28   :  { %386 = shalt.err (!%p383_p4)
}
  0x29   :  { %s387_s30 = scalar_lea.vmem %s41_s21, 512  ;;  %p392_p6 = scmp.lt.s32.totalorder %s41_s21, %s41_s21 }
  0x2a   :  { %p388_p5 = scmp.ne.s32.totalorder %s41_s21, %s387_s30  ;;  %p393_p7 = scmp.lt.s32.totalorder %s387_s30, %s387_s30 }
  0x2c   :  { %p394_p8 = por %p393_p7, %p392_p6 }
  0x2e   :  { %p395_p9 = pnand %p394_p8, %p388_p5 }
  0x30   :  { %398 = shalt.err (!%p395_p9)
}
  0x31   :  { %s430_s0 = smov 128   ;;  %s431_s24 = smov 8  }
  0x32   :  { %46 = dma.hbm_to_vmem [thread:$0]  %s533_s2, 512, %s41_s21, [#allocation7], %s430_s0, %s430_s0, %s431_s24  }
  0x33   :  { %421 = dma.done.wait [#allocation4], 128  }
  0x34   :  { %422 = vsyncadd [#allocation4], 4294967168 }
  0x35   :  { %423 = dma.done.wait [#allocation7], 640  }
  0x36   :  { %424 = vsyncadd [#allocation7], 4294966656  ;;  %v432_v0 = vmov 0.0|0.0   ;;  %vm433_vm0 = vmmov 0   ;;  %v434_v1 = vmov 0.0   ;;  %v62_v2 = vld [vmem:[#allocation8] sm:$0xff]  ;;  %v237_v23 = vstv %s536_s5 }
  0x37   :  { %308 = vmatprep.subr.bf16.mxu0 %v432_v0  ;;  %314 = vmatprep.subr.bf16.mxu1 %v432_v0  ;;  %v63_v3 = vld [vmem:[#allocation8 + $0x8] sm:$0xff]  ;;  %v64_v4 = vld [vmem:[#allocation8 + $0x10] sm:$0xff]  ;;  %v65_v6 = vld [vmem:[#allocation8 + $0x18] sm:$0xff]  ;;  %vm74_vm1 = vcmask 261120   ;;  %v246_v29 = vlaneseq  ;;  %vm253_vm2 = vcmask 57344  }
  0x38   :  { %294 = vmatprep.mubr.msk.f32.mxu0 %vm433_vm0, %v434_v1  ;;  %305 = vmatprep.mubr.msk.f32.mxu1 %vm433_vm0, %v434_v1  ;;  %v309_v5 = vpack.c.bf16 %v63_v3, %v62_v2  ;;  %v312_v7 = vpack.c.bf16 %v65_v6, %v64_v4  ;;  %v67_v8 = vld [vmem:[#allocation3] sm:$0xff]  ;;  %v149_v9 = vld [vmem:[#allocation6] sm:$0xff] }
  0x39   :  { %v271_v10 = vld [vmem:[%s534_s3] ss:$0 sm:$0xff]  ;;  %v247_v30 = vand.u32 127, %v246_v29  ;;  %v249_v31 = vshrl.u32 %v246_v29, 7  ;;  %s435_s3 = smov [#allocation9]  }
  0x3a   :  { %310 = vmatpush3.bf16.msra.mxu0 %v309_v5  ;;  %316 = vmatpush3.bf16.msra.mxu1 %v309_v5  ;;  %v274_v19 = vld [vmem:[%s535_s4] ss:$0 sm:$0xff]  ;;  %s261_s4 = sshll.u32 %s435_s3, 4  ;;  %s262_s4 = int_to_ptr.vmem [resolvable:$true] %s261_s4 }
  0x3b   :  { %311 = vmatprep.subr.bf16.mxu0 %v432_v0  ;;  %317 = vmatprep.subr.bf16.mxu1 %v432_v0  ;;  %v250_v32 = vsub.s32 %v247_v30, %v249_v31  ;;  %s399_s14 = scalar_lea.vmem %s262_s4, 16  ;;  %s403_s5 = scalar_lea.vmem %s262_s4, 32 }
  0x3c   :  { %p400_p10 = scmp.ne.s32.totalorder %s262_s4, %s399_s14  ;;  %p404_p11 = scmp.lt.s32.totalorder %s262_s4, %s262_s4 }
  0x3d   :  { %p405_p12 = scmp.lt.s32.totalorder %s403_s5, %s399_s14 }
  0x3e   :  { %313 = vmatpush3.bf16.msra.mxu0 %v312_v7  ;;  %319 = vmatpush3.bf16.msra.mxu1 %v312_v7 }
  0x3f   :  { %p406_p13 = por %p405_p12, %p404_p11 }
  0x41   :  { %295 = vmatmul.mubr.msk.f32.vlgmr.msra.gmra.mrb[0].mxu0 %vm74_vm1, %v67_v8  ;;  %306 = vmatmul.mubr.msk.f32.vlgmr.msra.gmra.mrb[0].mxu1 %vm74_vm1, %v149_v9  ;;  %p407_p0 = pnand %p406_p13, %p400_p10 }
 0x114   :  { %v144_v11 = vpop.f32.mrb[0].mxu0  ;;  %v219_v12 = vpop.f32.mrb[0].mxu1 }
 0x115   :  { %v145_v13 = vadd.f32 %v271_v10, %v144_v11  ;;  %v220_v14 = vadd.f32 %v271_v10, %v219_v12  ;;  %v296_v15 = vpop.f32.mrb[1].mxu0  ;;  %v307_v16 = vpop.f32.mrb[1].mxu1 }
 0x117   :  { %v148_v17 = vmax.f32 %v145_v13, 0.0  ;;  %v223_v18 = vmax.f32 %v220_v14, 0.0 }
 0x119   :  { %v224_v20 = vmul.f32 %v223_v18, %v148_v17 }
 0x11b   :  { %v232_v21 = vmul.f32 %v274_v19, %v224_v20 }
 0x11d   :  { %v233_v22 = vsel %vm74_vm1, %v232_v21, 0.0 }
 0x11e   :  { %234 = vadd.xlane.f32.xlu0 %v233_v22 }
 0x1ab   :  { %v235_v24 = vpop.xlane.xlu0 %234 }
 0x1ac   :  { %v238_v25 = vadd.f32 %v237_v23, %v235_v24 }
 0x1ae   :  { %v275_v26 = vmul.f32 -1.442695, %v238_v25 }
 0x1b0   :  { %329 = vpow2.f32 %v275_v26 }
 0x1ba   :  { %v330_v27 = vpop.eup %329 }
 0x1bb   :  { %v242_v28 = vadd.f32 1.0, %v330_v27 }
 0x1bd   :  { %331 = vrcp.f32 %v242_v28 }
 0x1c7   :  { %v332_v33 = vpop.eup %331 }
 0x1c8   :  { %v251_v34 = vrot.slane %v332_v33, %v250_v32 }
 0x1ca   :  { %254 = vst.msk [vmem:[#allocation9] sm:$0x1] %vm253_vm2, %v251_v34 }
 0x1cb   :  { %410 = shalt.err (!%p407_p0)
}
 0x1cc   :  { %s411_s17 = scalar_lea.hbm %s537_s6, 16 }
 0x1cd   :  { %p412_p1 = scmp.ne.s32.totalorder %s537_s6, %s411_s17  ;;  %p415_p2 = scmp.lt.u32.totalorder %s411_s17, %s537_s6 }
 0x1cf   :  { %p417_p3 = pnand %p415_p2, %p412_p1 }
 0x1d1   :  { %420 = shalt.err (!%p417_p3)
}
 0x1d2   :  { %264 = dma.vmem_to_hbm [thread:$0]  %s262_s4, 16, %s537_s6, [#allocation5]  }
 0x1d3   :  { %425 = dma.done.wait [#allocation5], 16  }
 0x1d4   :  { %426 = vsyncadd [#allocation5], 4294967280 }
 0x1d5   :  { %268 = vsyncpa [#allocation4], 1 }
 0x1d6   :  { %269 = vsyncpa [#allocation7], 1 }
 0x1d7   :  { %270 = vsyncpa [#allocation5], 1 }

</bundles_post_ra>
